<compile_context>
chip_gen: v7x
topology: tpu7x:2x2x1
jax: 0.10.0
libtpu: 0.0.40
codegen_flags: <defaults>
</compile_context>

<pallas_src>
import jax
import jax.numpy as jnp
from jax.experimental import pallas as pl
from jax.experimental.pallas import tpu as pltpu


def mlp_kernel(x_ref, w1_ref, b1_ref, w2_ref, b2_ref, o_ref):
    # x_ref : (TB, S*D) native dtype     w1_ref: (S*D, H) bf16 (mean folded into fc1)
    # b1_ref: (1, H) f32                 w2_ref: (1, H) f32 (fc2 weight row)
    # b2_ref: (1, 1) f32 in SMEM         o_ref : (1, TB) f32 (lane-dense batch)
    xb = x_ref[...].astype(jnp.bfloat16)  # in-VMEM cast -> native bf16 MXU path

    # mean(dim=1) + fc1 as a single bf16 MXU matmul with f32 accumulation.
    h = jnp.dot(xb, w1_ref[...], preferred_element_type=jnp.float32) + b1_ref[...]
    h = jnp.maximum(h, 0.0)                                           # ReLU (VPU)

    # dropout(p=0.5): identity in eval mode.
    # TODO(synk): training-mode stochastic dropout (pltpu.prng_random_bits) not emitted.

    # fc2 with output_dim=1: VPU multiply + cross-lane (XLU) reduce; cheaper than a
    # 1-column MXU matmul and hidden under the x DMA.
    y = jnp.sum(h * w2_ref[...], axis=-1) + b2_ref[0, 0]              # (TB,)

    # sigmoid in f32; lane-dense store (batch lives on the 128-lane axis).
    o_ref[...] = jax.nn.sigmoid(y).reshape(o_ref.shape).astype(o_ref.dtype)


def _cdiv(a, b):
    return -(-a // b)


def _round_up(a, m):
    return _cdiv(a, m) * m


def _choose_tiling(batch, sd, hidden, x_itemsize):
    """Batch tile (rows) + VMEM limit, sized by bytes with lane-padded accounting."""
    try:
        info = pltpu.get_tpu_info()
        vmem_cap = int(getattr(info, "vmem_capacity_bytes", 64 << 20))
    except Exception:  # API unavailable: assume the smallest part (v7x: 64 MiB / TC)
        vmem_cap = 64 << 20
    # Stay well under per-core capacity: ~40 MiB on v7x, up to ~80-96 MiB on v5e/v6e.
    vmem_limit = min(vmem_cap * 5 // 8, 96 << 20)

    lane = 128
    sd_pad = _round_up(sd, lane)          # VMEM lane padding of the x tile
    h_pad = _round_up(hidden, lane)
    # Resident params (bf16 W1exp + f32 b1 + f32 w2 row); conservatively doubled.
    param_bytes = 2 * (_round_up(sd, 16) * h_pad * 2 + 2 * 8 * h_pad * 4)
    headroom = 4 << 20
    avail = max(vmem_limit - param_bytes - headroom, 4 << 20)

    row_bytes = max(1, sd_pad * x_itemsize)
    tile_budget = avail // 2              # two pipeline buffers for the x tile
    tb = max(128, (tile_budget // row_bytes) // 128 * 128)
    # Keep >= ~4 grid steps when the batch allows, so v7x's two TensorCores both get
    # work and the pipeline has depth.
    tb = min(tb, max(128, _round_up(_cdiv(batch, 4), 128)))
    if batch <= tb:
        tb = batch                        # single full-array block (always legal)

    need = 2 * tb * row_bytes + param_bytes + headroom
    vmem_limit = max(vmem_limit, min(need, vmem_cap))
    return int(tb), int(vmem_limit)


def mlp_classifier_forward(x, w1, b1, w2, b2):
    """x: (B, S, D); returns (y,) with y: (B, 1) f32 == MLPClassifier.forward(x) (eval)."""
    B, S, D = x.shape
    H = w1.shape[1]
    assert w2.shape == (H, 1), "kernel is specialized to output_dim=1 (module default)"
    SD = S * D

    # Free, contiguous metadata reshape; x keeps its native dtype (no extra HBM pass).
    x2d = x.reshape(B, SD)

    # Fold mean(dim=1) into fc1: W1exp[s*D+d, :] = w1[d, :] / S, so x2d @ W1exp ==
    # mean(x, dim=1) @ w1.  bf16 weights -> native MXU rate; accumulation stays f32.
    w1exp = (jnp.tile(w1.astype(jnp.float32), (S, 1)) * (1.0 / S)).astype(jnp.bfloat16)
    b1f = b1.reshape(1, H).astype(jnp.float32)
    w2_row = w2.reshape(1, H).astype(jnp.float32)   # (H,1) -> (1,H) for VPU mul+reduce
    b2s = b2.reshape(1, 1).astype(jnp.float32)

    tb, vmem_limit = _choose_tiling(B, SD, H, x2d.dtype.itemsize)
    num_tiles = _cdiv(B, tb)    # no jnp.pad of x: last tile is partial, rows >= B sliced off
    out_cols = num_tiles * tb   # output tiles always fully written (lane-dense vst)

    out = pl.pallas_call(
        mlp_kernel,
        out_shape=jax.ShapeDtypeStruct((1, out_cols), jnp.float32),
        grid_spec=pltpu.PrefetchScalarGridSpec(
            num_scalar_prefetch=0,
            grid=(num_tiles,),
            in_specs=[
                pl.BlockSpec((tb, SD), lambda i: (i, 0)),           # x: batch-tiled
                pl.BlockSpec((SD, H), lambda i: (0, 0)),            # W1exp: resident
                pl.BlockSpec((1, H), lambda i: (0, 0)),             # b1: resident
                pl.BlockSpec((1, H), lambda i: (0, 0)),             # w2 row: resident
                pl.BlockSpec(memory_space=pltpu.MemorySpace.SMEM),  # b2: scalar in SMEM
            ],
            out_specs=pl.BlockSpec((1, tb), lambda i: (0, i)),      # lane-dense output
        ),
        compiler_params=pltpu.CompilerParams(
            dimension_semantics=("parallel",),
            vmem_limit_bytes=vmem_limit,
        ),
    )(x2d, w1exp, b1f, w2_row, b2s)

    y = out[0, :B].reshape(B, 1)
    # PyTorch module returns a tuple (x,)
    return (y,)


def init_linear_params(key, in_features, out_features):
    """Deterministic PyTorch-style nn.Linear init: U(-1/sqrt(in), 1/sqrt(in))."""
    kw, kb = jax.random.split(key)
    bound = 1.0 / jnp.sqrt(jnp.float32(in_features))
    # Stored as (in, out) so the math is x @ W (== PyTorch x @ W.T).
    w = jax.random.uniform(kw, (in_features, out_features), jnp.float32, -bound, bound)
    b = jax.random.uniform(kb, (1, out_features), jnp.float32, -bound, bound)
    return w, b


if __name__ == "__main__":
    # Small shapes consistent with the forward pass: x is (batch, seq, input_dim).
    B, S, D, H, O = 2, 8, 16, 32, 1

    key = jax.random.PRNGKey(0)
    kx, k1, k2 = jax.random.split(key, 3)

    x = jax.random.normal(kx, (B, S, D), jnp.float32)
    w1, b1 = init_linear_params(k1, D, H)
    w2, b2 = init_linear_params(k2, H, O)

    fwd = jax.jit(mlp_classifier_forward)
    (out,) = fwd(x, w1, b1, w2, b2)
    out = jax.block_until_ready(out)
    assert out.shape == (B, O)

    # Reference 1: matches the kernel's numerics (bf16 MXU products, f32 accumulation).
    w1exp_ref = (jnp.tile(w1, (S, 1)) * (1.0 / S)).astype(jnp.bfloat16)
    xr = x.reshape(B, S * D).astype(jnp.bfloat16)
    h = jnp.maximum(jnp.dot(xr, w1exp_ref, preferred_element_type=jnp.float32) + b1, 0.0)
    ref_bf16 = jax.nn.sigmoid(h @ w2 + b2)
    assert jnp.allclose(out, ref_bf16, atol=2e-3, rtol=2e-3), "mismatch vs matched reference"

    # Reference 2: the pure f32 PyTorch-equivalent forward (looser: bf16 product rounding).
    xm = jnp.mean(x, axis=1)
    ref_f32 = jax.nn.sigmoid(jnp.maximum(xm @ w1 + b1, 0.0) @ w2 + b2)
    assert jnp.allclose(out, ref_f32, atol=1e-2, rtol=1e-2), "mismatch vs f32 reference"

    print("KERNEL_OK")
</pallas_src>

<mosaic_0001>
module attributes {stable_mosaic.version = 11 : i64} {
  func.func @mlp_kernel(%arg0: i32, %arg1: memref<2x128xf32, #tpu.memory_space<vmem>>, %arg2: memref<128x32xbf16, #tpu.memory_space<vmem>>, %arg3: memref<1x32xf32, #tpu.memory_space<vmem>>, %arg4: memref<1x32xf32, #tpu.memory_space<vmem>>, %arg5: memref<1x1xf32, #tpu.memory_space<smem>>, %arg6: memref<1x2xf32, #tpu.memory_space<vmem>>) attributes {dimension_semantics = [#tpu.dimension_semantics<parallel>], iteration_bounds = array<i64: 1>, scalar_prefetch = 0 : i64, scratch_operands = 0 : i64, tpu.core_type = #tpu.core_type<tc>, window_params = [{transform_indices = @transform_0, window_bounds = array<i64: 2, 128>}, {pipeline_mode = #tpu.pipeline_mode<synchronous>, transform_indices = @transform_1, window_bounds = array<i64: 128, 32>}, {pipeline_mode = #tpu.pipeline_mode<synchronous>, transform_indices = @transform_2, window_bounds = array<i64: 1, 32>}, {pipeline_mode = #tpu.pipeline_mode<synchronous>, transform_indices = @transform_3, window_bounds = array<i64: 1, 32>}, {transform_indices = @transform_4, window_bounds = array<i64: 1, 1>}, {transform_indices = @transform_5, window_bounds = array<i64: 1, 2>}]} {
    %c0 = arith.constant 0 : index
    %c0_0 = arith.constant 0 : index
    %0 = vector.load %arg1[%c0, %c0_0] : memref<2x128xf32, #tpu.memory_space<vmem>>, vector<2x128xf32>
    %1 = arith.truncf %0 : vector<2x128xf32> to vector<2x128xbf16>
    %c0_1 = arith.constant 0 : index
    %c0_2 = arith.constant 0 : index
    %2 = vector.load %arg2[%c0_1, %c0_2] : memref<128x32xbf16, #tpu.memory_space<vmem>>, vector<128x32xbf16>
    %cst = arith.constant dense<0.000000e+00> : vector<2x32xf32>
    %3 = tpu.matmul %1, %2, %cst {dimension_numbers = #tpu.dot_dimension_numbers<[1], [0], [0], [1], [0, 0, 1, 1], [], []>} : vector<2x128xbf16>, vector<128x32xbf16>, vector<2x32xf32> -> vector<2x32xf32>
    %c0_3 = arith.constant 0 : index
    %c0_4 = arith.constant 0 : index
    %4 = vector.load %arg3[%c0_3, %c0_4] : memref<1x32xf32, #tpu.memory_space<vmem>>, vector<1x32xf32>
    %5 = vector.broadcast %4 : vector<1x32xf32> to vector<2x32xf32>
    %6 = arith.addf %3, %5 : vector<2x32xf32>
    %cst_5 = arith.constant 0.000000e+00 : f32
    %7 = vector.broadcast %cst_5 : f32 to vector<2x32xf32>
    %8 = arith.maximumf %6, %7 : vector<2x32xf32>
    %c0_6 = arith.constant 0 : index
    %c0_7 = arith.constant 0 : index
    %9 = vector.load %arg4[%c0_6, %c0_7] : memref<1x32xf32, #tpu.memory_space<vmem>>, vector<1x32xf32>
    %10 = vector.broadcast %9 : vector<1x32xf32> to vector<2x32xf32>
    %11 = arith.mulf %8, %10 : vector<2x32xf32>
    %cst_8 = arith.constant dense<0.000000e+00> : vector<2xf32>
    %12 = vector.multi_reduction <add>, %11, %cst_8 [1] : vector<2x32xf32> to vector<2xf32>
    %c0_9 = arith.constant 0 : index
    %c0_10 = arith.constant 0 : index
    %13 = memref.load %arg5[%c0_9, %c0_10] : memref<1x1xf32, #tpu.memory_space<smem>>
    %14 = vector.broadcast %13 : f32 to vector<2xf32>
    %15 = arith.addf %12, %14 : vector<2xf32>
    %16 = arith.negf %15 : vector<2xf32>
    %17 = math.exp %16 : vector<2xf32>
    %cst_11 = arith.constant 1.000000e+00 : f32
    %18 = vector.broadcast %cst_11 : f32 to vector<2xf32>
    %19 = arith.addf %18, %17 : vector<2xf32>
    %20 = arith.divf %18, %19 : vector<2xf32>
    %21 = vector.shape_cast %20 : vector<2xf32> to vector<1x2xf32>
    %c0_12 = arith.constant 0 : index
    %c0_13 = arith.constant 0 : index
    %22 = vector.load %arg6[%c0_12, %c0_13] : memref<1x2xf32, #tpu.memory_space<vmem>>, vector<1x2xf32>
    tpu.vector_store %arg6[%c0_12, %c0_13], %21 {strides = array<i32>} : memref<1x2xf32, #tpu.memory_space<vmem>>, vector<1x2xf32>,
    return
  }
  func.func @transform_0(%arg0: i32) -> (i32, i32) {
    %c0_i32 = arith.constant 0 : i32
    %c0_i32_0 = arith.constant 0 : i32
    return %arg0, %c0_i32 : i32, i32
  }
  func.func @transform_1(%arg0: i32) -> (i32, i32) {
    %c0_i32 = arith.constant 0 : i32
    %c0_i32_0 = arith.constant 0 : i32
    %c0_i32_1 = arith.constant 0 : i32
    return %c0_i32, %c0_i32_0 : i32, i32
  }
  func.func @transform_2(%arg0: i32) -> (i32, i32) {
    %c0_i32 = arith.constant 0 : i32
    %c0_i32_0 = arith.constant 0 : i32
    %c0_i32_1 = arith.constant 0 : i32
    return %c0_i32, %c0_i32_0 : i32, i32
  }
  func.func @transform_3(%arg0: i32) -> (i32, i32) {
    %c0_i32 = arith.constant 0 : i32
    %c0_i32_0 = arith.constant 0 : i32
    %c0_i32_1 = arith.constant 0 : i32
    return %c0_i32, %c0_i32_0 : i32, i32
  }
  func.func @transform_4(%arg0: i32) -> (i32, i32) {
    %c0_i32 = arith.constant 0 : i32
    %c0_i32_0 = arith.constant 0 : i32
    %c0_i32_1 = arith.constant 0 : i32
    return %c0_i32, %c0_i32_0 : i32, i32
  }
  func.func @transform_5(%arg0: i32) -> (i32, i32) {
    %c0_i32 = arith.constant 0 : i32
    %c0_i32_0 = arith.constant 0 : i32
    return %c0_i32, %arg0 : i32, i32
  }
}

</mosaic_0001>

<bundles_post_ra>
// kernel: mlp_classifier_forward.1
= control target key start
LH: loop header
LB: loop body
LE: loop exit
PB: predicated region body
PF: predicated region fallthrough
CT: control target
= control target key end

     0   :  { %v261_v1 = vmov 0.0   ;;  %vm262_vm0 = vmmov 0   ;;  %s342_s0 = inlined_call_operand.vmem [shape: f32[2,128], index: 0, kind: input, shape index: {}]   ;;  %s343_s1 = inlined_call_operand.vmem [shape: bf16[128,32], index: 1, kind: input, shape index: {}]   ;;  %s344_s2 = inlined_call_operand.vmem [shape: f32[1,32], index: 2, kind: input, shape index: {}]   ;;  %s345_s3 = inlined_call_operand.vmem [shape: f32[1,32], index: 3, kind: input, shape index: {}]   ;;  %s346_s4 = inlined_call_operand.<no memory space> [shape: f32[1,1], index: 4, kind: input, shape index: {}]   ;;  %s347_s5 = inlined_call_operand.hbm [shape: f32[1,2], index: 5, kind: output, shape index: {}]  }
   0x1   :  { %v225_v0 = vld [vmem:[%s343_s1] sm:$0xff]   ;;  %202 = vmatprep.subr.bf16.mxu0 %v261_v1  ;;  %v226_v2 = vld [vmem:[%s343_s1 + $0x8] sm:$0xff]   ;;  %218 = vmatprep.mubr.msk.bf16.mxu0 %vm262_vm0, %v261_v1  ;;  %v227_v3 = vld [vmem:[%s343_s1 + $0x10] sm:$0xff]  }
   0x2   :  { %203 = vmatpush3.bf16.msra.mxu0 %v225_v0 }
   0x3   :  { %204 = vmatprep.subr.bf16.mxu0 %v261_v1 }
   0x6   :  { %205 = vmatpush3.bf16.msra.mxu0 %v226_v2 }
   0x7   :  { %206 = vmatprep.subr.bf16.mxu0 %v261_v1 }
   0x8   :  { %11 = vsyncpa [#allocation4], 0  ;;  %v228_v4 = vld [vmem:[%s343_s1 + $0x18] sm:$0xff]   ;;  %v229_v5 = vld [vmem:[%s343_s1 + $0x20] sm:$0xff]   ;;  %vm145_vm1 = vcmask 254976   ;;  %v150_v21 = vstv %s346_s4  ;;  %v159_v27 = vlaneseq  ;;  %vm166_vm2 = vcmask 8192  }
   0x9   :  { %v230_v6 = vld [vmem:[%s343_s1 + $0x28] sm:$0xff]   ;;  %v231_v7 = vld [vmem:[%s343_s1 + $0x30] sm:$0xff]   ;;  %v232_v8 = vld [vmem:[%s343_s1 + $0x38] sm:$0xff]  }
   0xa   :  { %207 = vmatpush3.bf16.msra.mxu0 %v227_v3  ;;  %v23_v9 = vld [vmem:[%s342_s0] sm:$0x3]  ;;  %v160_v28 = vand.u32 127, %v159_v27  ;;  %v162_v29 = vshrl.u32 %v159_v27, 7 }
   0xb   :  { %208 = vmatprep.subr.bf16.mxu0 %v261_v1  ;;  %v24_v10 = vpack.c.bf16 %v23_v9, %v23_v9  ;;  %v182_v11 = vld [vmem:[%s344_s2] ss:$0 sm:$0xff]  ;;  %s263_s2 = smov [#allocation3]  }
   0xc   :  { %v191_v16 = vld [vmem:[%s345_s3] ss:$0 sm:$0xff]  ;;  %v163_v30 = vsub.s32 %v160_v28, %v162_v29  ;;  %s174_s3 = sshll.u32 %s263_s2, 4  ;;  %s175_s3 = int_to_ptr.vmem [resolvable:$true] %s174_s3 }
   0xd   :  { %s237_s15 = scalar_lea.vmem %s175_s3, 16  ;;  %s241_s4 = scalar_lea.vmem %s175_s3, 32 }
   0xe   :  { %209 = vmatpush3.bf16.msra.mxu0 %v228_v4  ;;  %p238_p0 = scmp.ne.s32.totalorder %s175_s3, %s237_s15  ;;  %p242_p1 = scmp.lt.s32.totalorder %s175_s3, %s175_s3 }
   0xf   :  { %210 = vmatprep.subr.bf16.mxu0 %v261_v1  ;;  %p243_p2 = scmp.lt.s32.totalorder %s241_s4, %s237_s15 }
  0x11   :  { %p244_p3 = por %p243_p2, %p242_p1 }
  0x12   :  { %211 = vmatpush3.bf16.msra.mxu0 %v229_v5 }
  0x13   :  { %212 = vmatprep.subr.bf16.mxu0 %v261_v1  ;;  %p245_p4 = pnand %p244_p3, %p238_p0 }
  0x16   :  { %213 = vmatpush3.bf16.msra.mxu0 %v230_v6 }
  0x17   :  { %214 = vmatprep.subr.bf16.mxu0 %v261_v1 }
  0x1a   :  { %215 = vmatpush3.bf16.msra.mxu0 %v231_v7 }
  0x1b   :  { %216 = vmatprep.subr.bf16.mxu0 %v261_v1 }
  0x1e   :  { %217 = vmatpush3.bf16.msra.mxu0 %v232_v8 }
  0x21   :  { %219 = vmatmul.mubr.bf16.vlgmr.msra.gmra.mrb[0].mxu0 %v24_v10 }
  0xf4   :  { %v130_v12 = vpop.f32.mrb[0].mxu0 }
  0xf5   :  { %v131_v13 = vadd.f32 %v182_v11, %v130_v12  ;;  %v220_v14 = vpop.f32.mrb[1].mxu0 }
  0xf6   :  { %v133_v15 = vpop.f32.mrb[2].mxu0 }
  0xf7   :  { %v136_v17 = vmax.f32 %v131_v13, 0.0  ;;  %v221_v18 = vpop.f32.mrb[3].mxu0 }
  0xf9   :  { %v144_v19 = vmul.f32 %v191_v16, %v136_v17 }
  0xfb   :  { %v146_v20 = vsel %vm145_vm1, %v144_v19, 0.0 }
  0xfc   :  { %147 = vadd.xlane.f32.xlu0 %v146_v20 }
 0x189   :  { %v148_v22 = vpop.xlane.xlu0 %147 }
 0x18a   :  { %v151_v23 = vadd.f32 %v150_v21, %v148_v22 }
 0x18c   :  { %v192_v24 = vmul.f32 -1.442695, %v151_v23 }
 0x18e   :  { %233 = vpow2.f32 %v192_v24 }
 0x198   :  { %v234_v25 = vpop.eup %233 }
 0x199   :  { %v155_v26 = vadd.f32 1.0, %v234_v25 }
 0x19b   :  { %235 = vrcp.f32 %v155_v26 }
 0x1a5   :  { %v236_v31 = vpop.eup %235 }
 0x1a6   :  { %v164_v32 = vrot.slane %v236_v31, %v163_v30 }
 0x1a8   :  { %167 = vst.msk [vmem:[#allocation3] sm:$0x1] %vm166_vm2, %v164_v32 }
 0x1a9   :  { %248 = shalt.err (!%p245_p4)
}
 0x1aa   :  { %s249_s18 = scalar_lea.hbm %s347_s5, 16 }
 0x1ab   :  { %p250_p5 = scmp.ne.s32.totalorder %s347_s5, %s249_s18  ;;  %p253_p6 = scmp.lt.u32.totalorder %s249_s18, %s347_s5 }
 0x1ad   :  { %p255_p7 = pnand %p253_p6, %p250_p5 }
 0x1af   :  { %258 = shalt.err (!%p255_p7)
}
 0x1b0   :  { %177 = dma.vmem_to_hbm [thread:$0]  %s175_s3, 16, %s347_s5, [#allocation4]  }
 0x1b1   :  { %259 = dma.done.wait [#allocation4], 16  }
 0x1b2   :  { %260 = vsyncadd [#allocation4], 4294967280 }
 0x1b3   :  { %181 = vsyncpa [#allocation4], 1 }

</bundles_post_ra>
